<compile_context>
chip_gen: v7x
topology: tpu7x:2x2x1
jax: 0.10.0
libtpu: 0.0.40
codegen_flags: <defaults>
</compile_context>

<pallas_src>
import functools

import jax
import jax.numpy as jnp
from jax.experimental import pallas as pl
from jax.experimental.pallas import tpu as pltpu


LANE = 128      # pad feature dims to a multiple of the 128-lane vreg width
TILE_N = 512    # node-tile size (sweep 256-1024; 512 is a good default)
BPAD = 16       # pad the graph/batch dim to a multiple of 16 (bf16 sublanes)


def _round_up(x, m):
    return ((x + m - 1) // m) * m


def _pad2(a, rows, cols):
    return jnp.pad(a, ((0, rows - a.shape[0]), (0, cols - a.shape[1])))


# ------------------------------ Pallas kernel -------------------------------

def gin_layer_kernel(x_ref, ohT_ref, oh_ref, mean_ref,
                     w1_ref, b1_ref, w2_ref, b2_ref,
                     node_out_ref, gpart_ref, *, eps, out_dtype):
    """One GIN layer on one node tile.

    agg  = onehot^T_tile @ mean_g            (row-gather as an MXU matmul)
    h    = (1+eps)*x_tile + agg
    out  = MLP(h) = relu(h @ W1 + b1) @ W2 + b2
    node_out_tile  = out
    graph_partial  = onehot_tile @ out       (per-tile readout partial sums,
                                              reduced & rescaled in wrapper)
    """
    f32, bf16 = jnp.float32, jnp.bfloat16

    # True gather via one-hot matmul: [tile_n, B] @ [B, Din] (both bf16, exact).
    agg = jnp.dot(ohT_ref[...], mean_ref[...], preferred_element_type=f32)

    x = x_ref[...].astype(f32)
    if eps == 0.0:                      # static: skip the (1+eps) multiply
        h = x + agg
    else:
        h = (1.0 + eps) * x + agg

    h = jnp.dot(h.astype(bf16), w1_ref[...],
                preferred_element_type=f32) + b1_ref[...]
    h = jnp.maximum(h, 0.0)
    out = jnp.dot(h.astype(bf16), w2_ref[...],
                  preferred_element_type=f32) + b2_ref[...]

    node_out_ref[...] = out.astype(out_dtype)
    gpart_ref[0, :, :] = jnp.dot(oh_ref[...], out.astype(bf16),
                                 preferred_element_type=f32)


def gin_layer(x_bf, ohT_bf, oh_bf, mean_bf, w1, b1, w2, b2, *,
              eps, tile_n, out_dtype):
    n_pad, din_p = x_bf.shape
    b_pad = oh_bf.shape[0]
    dout_p = w2.shape[1]
    n_tiles = n_pad // tile_n

    kernel = functools.partial(gin_layer_kernel, eps=float(eps),
                               out_dtype=out_dtype)

    out_shape = (jax.ShapeDtypeStruct((n_pad, dout_p), out_dtype),
                 jax.ShapeDtypeStruct((n_tiles, b_pad, dout_p), jnp.float32))
    out_specs = (pl.BlockSpec((tile_n, dout_p), lambda i: (i, 0)),
                 pl.BlockSpec((1, b_pad, dout_p), lambda i: (i, 0, 0)))

    grid_spec = pltpu.PrefetchScalarGridSpec(
        num_scalar_prefetch=0,
        grid=(n_tiles,),
        in_specs=[
            pl.BlockSpec((tile_n, din_p), lambda i: (i, 0)),   # x tile (bf16)
            pl.BlockSpec((tile_n, b_pad), lambda i: (i, 0)),   # one-hot^T tile
            pl.BlockSpec((b_pad, tile_n), lambda i: (0, i)),   # one-hot tile
            pl.BlockSpec((b_pad, din_p),  lambda i: (0, 0)),   # per-graph mean
            pl.BlockSpec((din_p, din_p),  lambda i: (0, 0)),   # W1
            pl.BlockSpec((1, din_p),      lambda i: (0, 0)),   # b1
            pl.BlockSpec((din_p, dout_p), lambda i: (0, 0)),   # W2
            pl.BlockSpec((1, dout_p),     lambda i: (0, 0)),   # b2
        ],
        out_specs=out_specs,
    )

    flops = (2 * n_pad * b_pad * din_p        # gather matmul
             + 2 * n_pad * din_p * din_p      # W1
             + 2 * n_pad * din_p * dout_p     # W2
             + 2 * n_pad * b_pad * dout_p)    # readout partials
    bytes_accessed = (n_pad * din_p * 2 + 2 * n_pad * b_pad * 2
                      + b_pad * din_p * 2
                      + din_p * (din_p + dout_p) * 2 + (din_p + dout_p) * 4
                      + n_pad * dout_p * jnp.dtype(out_dtype).itemsize
                      + n_tiles * b_pad * dout_p * 4)

    return pl.pallas_call(
        kernel,
        out_shape=out_shape,
        grid_spec=grid_spec,
        compiler_params=pltpu.CompilerParams(
            dimension_semantics=("parallel",)),   # node tiles are independent
        cost_estimate=pl.CostEstimate(flops=int(flops), transcendentals=0,
                                      bytes_accessed=int(bytes_accessed)),
    )(x_bf, ohT_bf, oh_bf, mean_bf, w1, b1, w2, b2)


# -------------------------------- Model glue --------------------------------

def init_params(key, num_unit, input_dim, hidden_dims):
    """Raw f32 parameters mirroring the torch module."""
    dims = [input_dim] + list(hidden_dims)
    keys = jax.random.split(key, 1 + 4 * (len(dims) - 1))
    params = {
        "embedding": jax.random.normal(keys[0], (num_unit, input_dim),
                                       jnp.float32) * 0.1,
        "layers": [],
    }
    k = 1
    for i in range(len(dims) - 1):
        din, dout = dims[i], dims[i + 1]
        w1 = jax.random.normal(keys[k], (din, din), jnp.float32) / jnp.sqrt(din)
        b1 = jax.random.normal(keys[k + 1], (1, din), jnp.float32) * 0.01
        w2 = jax.random.normal(keys[k + 2], (din, dout), jnp.float32) / jnp.sqrt(din)
        b2 = jax.random.normal(keys[k + 3], (1, dout), jnp.float32) * 0.01
        k += 4
        params["layers"].append({"w1": w1, "b1": b1, "w2": w2, "b2": b2,
                                 "eps": 0.0})
    return params


def prepare_params(params):
    """One-time pad-to-128-lanes + bf16 cast of the MLP weights (kernel view)."""
    prep = {"embedding": params["embedding"], "layers": []}
    for layer in params["layers"]:
        din, dout = layer["w1"].shape[0], layer["w2"].shape[1]
        dip, dop = _round_up(din, LANE), _round_up(dout, LANE)
        prep["layers"].append({
            "w1": _pad2(layer["w1"], dip, dip).astype(jnp.bfloat16),
            "b1": _pad2(layer["b1"], 1, dip).astype(jnp.float32),
            "w2": _pad2(layer["w2"], dip, dop).astype(jnp.bfloat16),
            "b2": _pad2(layer["b2"], 1, dop).astype(jnp.float32),
            "eps": layer["eps"], "din": din, "dout": dout,
        })
    return prep


def glycan_gin_forward(prep, unit_type, node2graph, batch_size,
                       tile_n_max=TILE_N):
    f32, bf16 = jnp.float32, jnp.bfloat16
    emb = prep["embedding"]
    input_dim = emb.shape[1]
    n = int(unit_type.shape[0])
    num_layers = len(prep["layers"])

    tile_n = min(tile_n_max, _round_up(max(n, 1), 16))
    n_pad = _round_up(max(n, 1), tile_n)
    b_pad = _round_up(max(batch_size, 1), BPAD)

    # --- glue (plain JAX): embedding lookup, one-hot membership, padding ---
    # TODO(synk): nn.Embedding row gather stays as a plain-JAX jnp.take.
    x = jnp.take(emb, unit_type, axis=0)                         # [N, Din] f32
    din_p0 = _round_up(input_dim, LANE)
    x_pad = jnp.zeros((n_pad, din_p0), bf16).at[:n, :input_dim].set(
        x.astype(bf16))

    n2g = node2graph.astype(jnp.int32)
    gids = jnp.arange(batch_size, dtype=jnp.int32)
    onehot = (n2g[None, :] == gids[:, None])                     # [B, N] bool
    oh_pad = jnp.zeros((b_pad, n_pad), bf16).at[:batch_size, :n].set(
        onehot.astype(bf16))
    ohT_pad = oh_pad.T                                           # [N_pad, B_pad]
    counts = jnp.sum(onehot.astype(f32), axis=1, keepdims=True)
    inv_count = jnp.ones((b_pad, 1), f32).at[:batch_size].set(
        1.0 / jnp.maximum(counts, 1.0))

    # Layer-0 per-graph mean: tiny [B_pad, Din_p] plain-JAX op.
    mean_bf = ((jnp.dot(oh_pad, x_pad, preferred_element_type=f32) * inv_count)
               .astype(bf16))

    # --- GIN layers: one single-phase Pallas kernel each; each layer also ---
    # --- emits per-tile graph partial sums that seed the next layer's mean ---
    layer_x = x_pad
    node_feature = graph_feature = None
    for li, layer in enumerate(prep["layers"]):
        is_last = (li == num_layers - 1)
        out_dtype = f32 if is_last else bf16
        node_out, gpart = gin_layer(
            layer_x, ohT_pad, oh_pad, mean_bf,
            layer["w1"], layer["b1"], layer["w2"], layer["b2"],
            eps=layer["eps"], tile_n=tile_n, out_dtype=out_dtype)
        gsums = jnp.sum(gpart, axis=0)                           # [B_pad, Dout_p]
        if is_last:
            dout = layer["dout"]
            node_feature = node_out[:n, :dout]        # concat_hidden=False
            graph_feature = gsums[:batch_size, :dout]  # readout='sum'
        else:
            mean_bf = (gsums * inv_count).astype(bf16)
            layer_x = node_out
    return {"graph_feature": graph_feature, "node_feature": node_feature}


# ----------------------------- Reference (JAX) ------------------------------

def reference_forward(params, unit_type, node2graph, batch_size):
    """Pure-JAX reference mirroring the kernel's numerics (bf16 MXU operands,
    bf16 inter-layer activation storage, f32 accumulation).

    Relative to the exact f32 PyTorch module this differs only by bf16
    rounding of matmul operands / stored activations (well under 1% relative).
    """
    f32, bf16 = jnp.float32, jnp.bfloat16
    num_layers = len(params["layers"])

    x = jnp.take(params["embedding"], unit_type, axis=0).astype(bf16)
    gids = jnp.arange(batch_size, dtype=jnp.int32)
    onehot = (node2graph.astype(jnp.int32)[None, :] == gids[:, None])
    onehot_bf = onehot.astype(bf16)
    inv_count = 1.0 / jnp.maximum(onehot.astype(f32).sum(1, keepdims=True), 1.0)

    layer_input = x                                   # bf16 storage
    for li, layer in enumerate(params["layers"]):
        sums = jnp.dot(onehot_bf, layer_input.astype(bf16),
                       preferred_element_type=f32)
        mean_g = (sums * inv_count).astype(bf16)
        agg = mean_g.astype(f32)[node2graph]
        h = (1.0 + layer["eps"]) * layer_input.astype(f32) + agg
        h = jnp.dot(h.astype(bf16), layer["w1"].astype(bf16),
                    preferred_element_type=f32) + layer["b1"]
        h = jnp.maximum(h, 0.0)
        out = jnp.dot(h.astype(bf16), layer["w2"].astype(bf16),
                      preferred_element_type=f32) + layer["b2"]
        layer_input = out if li == num_layers - 1 else out.astype(bf16)

    node_feature = layer_input                        # f32
    graph_feature = jnp.dot(onehot_bf, node_feature.astype(bf16),
                            preferred_element_type=f32)
    return {"graph_feature": graph_feature, "node_feature": node_feature}


# ----------------------------------- Main ------------------------------------

if __name__ == "__main__":
    num_unit = 10       # monosaccharide vocabulary (embedding rows)
    input_dim = 32
    hidden_dims = [32, 32]
    n_nodes = 16        # total nodes across the batch of graphs
    batch_size = 2      # graphs in the batch

    key = jax.random.PRNGKey(0)
    k_param, k_units = jax.random.split(key)

    params = init_params(k_param, num_unit, input_dim, hidden_dims)
    prep = prepare_params(params)       # pad & cast weights ONCE
    unit_type = jax.random.randint(k_units, (n_nodes,), 0, num_unit,
                                   dtype=jnp.int32)
    # first 8 nodes -> graph 0, last 8 nodes -> graph 1
    node2graph = jnp.concatenate([jnp.zeros(8, jnp.int32),
                                  jnp.ones(8, jnp.int32)])

    out = glycan_gin_forward(prep, unit_type, node2graph, batch_size)
    out = jax.block_until_ready(out)

    ref = reference_forward(params, unit_type, node2graph, batch_size)
    assert out["node_feature"].shape == (n_nodes, hidden_dims[-1])
    assert out["graph_feature"].shape == (batch_size, hidden_dims[-1])
    assert jnp.allclose(out["node_feature"], ref["node_feature"],
                        atol=2e-2, rtol=2e-2)
    assert jnp.allclose(out["graph_feature"], ref["graph_feature"],
                        atol=2e-2, rtol=2e-2)

    print("KERNEL_OK")
</pallas_src>

<mosaic_0001>
module attributes {stable_mosaic.version = 11 : i64} {
  func.func @gin_layer_kernel(%arg0: i32, %arg1: memref<16x128xbf16, #tpu.memory_space<vmem>>, %arg2: memref<16x16xbf16, #tpu.memory_space<vmem>>, %arg3: memref<16x16xbf16, #tpu.memory_space<vmem>>, %arg4: memref<16x128xbf16, #tpu.memory_space<vmem>>, %arg5: memref<128x128xbf16, #tpu.memory_space<vmem>>, %arg6: memref<1x128xf32, #tpu.memory_space<vmem>>, %arg7: memref<128x128xbf16, #tpu.memory_space<vmem>>, %arg8: memref<1x128xf32, #tpu.memory_space<vmem>>, %arg9: memref<16x128xbf16, #tpu.memory_space<vmem>>, %arg10: memref<1x16x128xf32, #tpu.memory_space<vmem>>) attributes {dimension_semantics = [#tpu.dimension_semantics<parallel>], iteration_bounds = array<i64: 1>, scalar_prefetch = 0 : i64, scratch_operands = 0 : i64, tpu.core_type = #tpu.core_type<tc>, window_params = [{transform_indices = @transform_0, window_bounds = array<i64: 16, 128>}, {transform_indices = @transform_1, window_bounds = array<i64: 16, 16>}, {transform_indices = @transform_2, window_bounds = array<i64: 16, 16>}, {pipeline_mode = #tpu.pipeline_mode<synchronous>, transform_indices = @transform_3, window_bounds = array<i64: 16, 128>}, {pipeline_mode = #tpu.pipeline_mode<synchronous>, transform_indices = @transform_4, window_bounds = array<i64: 128, 128>}, {pipeline_mode = #tpu.pipeline_mode<synchronous>, transform_indices = @transform_5, window_bounds = array<i64: 1, 128>}, {pipeline_mode = #tpu.pipeline_mode<synchronous>, transform_indices = @transform_6, window_bounds = array<i64: 128, 128>}, {pipeline_mode = #tpu.pipeline_mode<synchronous>, transform_indices = @transform_7, window_bounds = array<i64: 1, 128>}, {transform_indices = @transform_8, window_bounds = array<i64: 16, 128>}, {transform_indices = @transform_9, window_bounds = array<i64: 1, 16, 128>}]} {
    %c0 = arith.constant 0 : index
    %c0_0 = arith.constant 0 : index
    %0 = vector.load %arg2[%c0, %c0_0] : memref<16x16xbf16, #tpu.memory_space<vmem>>, vector<16x16xbf16>
    %c0_1 = arith.constant 0 : index
    %c0_2 = arith.constant 0 : index
    %1 = vector.load %arg4[%c0_1, %c0_2] : memref<16x128xbf16, #tpu.memory_space<vmem>>, vector<16x128xbf16>
    %cst = arith.constant dense<0.000000e+00> : vector<16x128xf32>
    %2 = tpu.matmul %0, %1, %cst {dimension_numbers = #tpu.dot_dimension_numbers<[1], [0], [0], [1], [0, 0, 1, 1], [], []>} : vector<16x16xbf16>, vector<16x128xbf16>, vector<16x128xf32> -> vector<16x128xf32>
    %c0_3 = arith.constant 0 : index
    %c0_4 = arith.constant 0 : index
    %3 = vector.load %arg1[%c0_3, %c0_4] : memref<16x128xbf16, #tpu.memory_space<vmem>>, vector<16x128xbf16>
    %4 = arith.extf %3 : vector<16x128xbf16> to vector<16x128xf32>
    %5 = arith.addf %4, %2 : vector<16x128xf32>
    %6 = arith.truncf %5 : vector<16x128xf32> to vector<16x128xbf16>
    %c0_5 = arith.constant 0 : index
    %c0_6 = arith.constant 0 : index
    %7 = vector.load %arg5[%c0_5, %c0_6] : memref<128x128xbf16, #tpu.memory_space<vmem>>, vector<128x128xbf16>
    %cst_7 = arith.constant dense<0.000000e+00> : vector<16x128xf32>
    %8 = tpu.matmul %6, %7, %cst_7 {dimension_numbers = #tpu.dot_dimension_numbers<[1], [0], [0], [1], [0, 0, 1, 1], [], []>} : vector<16x128xbf16>, vector<128x128xbf16>, vector<16x128xf32> -> vector<16x128xf32>
    %c0_8 = arith.constant 0 : index
    %c0_9 = arith.constant 0 : index
    %9 = vector.load %arg6[%c0_8, %c0_9] : memref<1x128xf32, #tpu.memory_space<vmem>>, vector<1x128xf32>
    %10 = vector.broadcast %9 : vector<1x128xf32> to vector<16x128xf32>
    %11 = arith.addf %8, %10 : vector<16x128xf32>
    %cst_10 = arith.constant 0.000000e+00 : f32
    %12 = vector.broadcast %cst_10 : f32 to vector<16x128xf32>
    %13 = arith.maximumf %11, %12 : vector<16x128xf32>
    %14 = arith.truncf %13 : vector<16x128xf32> to vector<16x128xbf16>
    %c0_11 = arith.constant 0 : index
    %c0_12 = arith.constant 0 : index
    %15 = vector.load %arg7[%c0_11, %c0_12] : memref<128x128xbf16, #tpu.memory_space<vmem>>, vector<128x128xbf16>
    %cst_13 = arith.constant dense<0.000000e+00> : vector<16x128xf32>
    %16 = tpu.matmul %14, %15, %cst_13 {dimension_numbers = #tpu.dot_dimension_numbers<[1], [0], [0], [1], [0, 0, 1, 1], [], []>} : vector<16x128xbf16>, vector<128x128xbf16>, vector<16x128xf32> -> vector<16x128xf32>
    %c0_14 = arith.constant 0 : index
    %c0_15 = arith.constant 0 : index
    %17 = vector.load %arg8[%c0_14, %c0_15] : memref<1x128xf32, #tpu.memory_space<vmem>>, vector<1x128xf32>
    %18 = vector.broadcast %17 : vector<1x128xf32> to vector<16x128xf32>
    %19 = arith.addf %16, %18 : vector<16x128xf32>
    %20 = arith.truncf %19 : vector<16x128xf32> to vector<16x128xbf16>
    %c0_16 = arith.constant 0 : index
    %c0_17 = arith.constant 0 : index
    %21 = vector.load %arg9[%c0_16, %c0_17] : memref<16x128xbf16, #tpu.memory_space<vmem>>, vector<16x128xbf16>
    tpu.vector_store %arg9[%c0_16, %c0_17], %20 {strides = array<i32>} : memref<16x128xbf16, #tpu.memory_space<vmem>>, vector<16x128xbf16>,
    %c0_18 = arith.constant 0 : index
    %c0_19 = arith.constant 0 : index
    %22 = vector.load %arg3[%c0_18, %c0_19] : memref<16x16xbf16, #tpu.memory_space<vmem>>, vector<16x16xbf16>
    %23 = arith.truncf %19 : vector<16x128xf32> to vector<16x128xbf16>
    %cst_20 = arith.constant dense<0.000000e+00> : vector<16x128xf32>
    %24 = tpu.matmul %22, %23, %cst_20 {dimension_numbers = #tpu.dot_dimension_numbers<[1], [0], [0], [1], [0, 0, 1, 1], [], []>} : vector<16x16xbf16>, vector<16x128xbf16>, vector<16x128xf32> -> vector<16x128xf32>
    %c0_21 = arith.constant 0 : index
    %c0_22 = arith.constant 0 : index
    %c0_23 = arith.constant 0 : index
    %25 = vector.load %arg10[%c0_21, %c0_22, %c0_23] : memref<1x16x128xf32, #tpu.memory_space<vmem>>, vector<1x16x128xf32>
    %26 = vector.shape_cast %25 : vector<1x16x128xf32> to vector<16x128xf32>
    %27 = vector.shape_cast %24 : vector<16x128xf32> to vector<1x16x128xf32>
    tpu.vector_store %arg10[%c0_21, %c0_22, %c0_23], %27 {strides = array<i32>} : memref<1x16x128xf32, #tpu.memory_space<vmem>>, vector<1x16x128xf32>,
    return
  }
  func.func @transform_0(%arg0: i32) -> (i32, i32) {
    %c0_i32 = arith.constant 0 : i32
    %c0_i32_0 = arith.constant 0 : i32
    return %arg0, %c0_i32 : i32, i32
  }
  func.func @transform_1(%arg0: i32) -> (i32, i32) {
    %c0_i32 = arith.constant 0 : i32
    %c0_i32_0 = arith.constant 0 : i32
    return %arg0, %c0_i32 : i32, i32
  }
  func.func @transform_2(%arg0: i32) -> (i32, i32) {
    %c0_i32 = arith.constant 0 : i32
    %c0_i32_0 = arith.constant 0 : i32
    return %c0_i32, %arg0 : i32, i32
  }
  func.func @transform_3(%arg0: i32) -> (i32, i32) {
    %c0_i32 = arith.constant 0 : i32
    %c0_i32_0 = arith.constant 0 : i32
    %c0_i32_1 = arith.constant 0 : i32
    return %c0_i32, %c0_i32_0 : i32, i32
  }
  func.func @transform_4(%arg0: i32) -> (i32, i32) {
    %c0_i32 = arith.constant 0 : i32
    %c0_i32_0 = arith.constant 0 : i32
    %c0_i32_1 = arith.constant 0 : i32
    return %c0_i32, %c0_i32_0 : i32, i32
  }
  func.func @transform_5(%arg0: i32) -> (i32, i32) {
    %c0_i32 = arith.constant 0 : i32
    %c0_i32_0 = arith.constant 0 : i32
    %c0_i32_1 = arith.constant 0 : i32
    return %c0_i32, %c0_i32_0 : i32, i32
  }
  func.func @transform_6(%arg0: i32) -> (i32, i32) {
    %c0_i32 = arith.constant 0 : i32
    %c0_i32_0 = arith.constant 0 : i32
    %c0_i32_1 = arith.constant 0 : i32
    return %c0_i32, %c0_i32_0 : i32, i32
  }
  func.func @transform_7(%arg0: i32) -> (i32, i32) {
    %c0_i32 = arith.constant 0 : i32
    %c0_i32_0 = arith.constant 0 : i32
    %c0_i32_1 = arith.constant 0 : i32
    return %c0_i32, %c0_i32_0 : i32, i32
  }
  func.func @transform_8(%arg0: i32) -> (i32, i32) {
    %c0_i32 = arith.constant 0 : i32
    %c0_i32_0 = arith.constant 0 : i32
    return %arg0, %c0_i32 : i32, i32
  }
  func.func @transform_9(%arg0: i32) -> (i32, i32, i32) {
    %c0_i32 = arith.constant 0 : i32
    %c0_i32_0 = arith.constant 0 : i32
    %c0_i32_1 = arith.constant 0 : i32
    return %arg0, %c0_i32, %c0_i32_0 : i32, i32, i32
  }
}

</mosaic_0001>

<bundles_post_ra>
// kernel: tpu_custom_call.1
= control target key start
LH: loop header
LB: loop body
LE: loop exit
PB: predicated region body
PF: predicated region fallthrough
CT: control target
= control target key end

     0   :  { %15 = vsyncpa [#allocation3], 0  ;;  %s1016_s0 = inlined_call_operand.hbm [shape: bf16[16,128], index: 0, kind: input, shape index: {}]   ;;  %s1017_s1 = inlined_call_operand.hbm [shape: bf16[16,16], index: 1, kind: input, shape index: {}]   ;;  %s1018_s2 = inlined_call_operand.hbm [shape: bf16[16,16], index: 2, kind: input, shape index: {}]   ;;  %s1019_s3 = inlined_call_operand.vmem [shape: bf16[16,128], index: 3, kind: input, shape index: {}]   ;;  %s1020_s4 = inlined_call_operand.hbm [shape: bf16[128,128], index: 4, kind: input, shape index: {}]   ;;  %s1021_s5 = inlined_call_operand.vmem [shape: f32[1,128], index: 5, kind: input, shape index: {}]   ;;  %s1022_s6 = inlined_call_operand.hbm [shape: bf16[128,128], index: 6, kind: input, shape index: {}]   ;;  %s1023_s7 = inlined_call_operand.vmem [shape: f32[1,128], index: 7, kind: input, shape index: {}]   ;;  %s1024_s8 = inlined_call_operand.hbm [shape: bf16[16,128], index: 8, kind: output, shape index: {0}]   ;;  %s1025_s9 = inlined_call_operand.hbm [shape: f32[1,16,128], index: 9, kind: output, shape index: {1}]  }
   0x1   :  { %16 = vsyncpa [#allocation6], 0 }
   0x2   :  { %17 = vsyncpa [#allocation9], 0 }
   0x3   :  { %18 = vsyncpa [#allocation4], 0 }
   0x4   :  { %19 = vsyncpa [#allocation13], 0  ;;  %s800_s30 = smov [#allocation5]   ;;  %s801_s11 = smov [#allocation8]  }
   0x5   :  { %s37_s10 = sshll.u32 %s800_s30, 4  ;;  %s63_s12 = sshll.u32 %s801_s11, 4  ;;  %s38_s10 = int_to_ptr.vmem [resolvable:$true] %s37_s10  ;;  %s863_s12 = int_to_ptr.vmem [resolvable:$true] %s63_s12 }
   0x6   :  { %s636_s15 = scalar_lea.hbm %s1017_s1, 128 }
   0x7   :  { %p637_p0 = scmp.ne.s32.totalorder %s1017_s1, %s636_s15  ;;  %p640_p1 = scmp.lt.u32.totalorder %s636_s15, %s1017_s1 }
   0x9   :  { %p642_p2 = pnand %p640_p1, %p637_p0 }
   0xb   :  { %645 = shalt.err (!%p642_p2)
}
   0xc   :  { %s646_s20 = scalar_lea.vmem %s38_s10, 128  ;;  %p651_p4 = scmp.lt.s32.totalorder %s38_s10, %s38_s10 }
   0xd   :  { %p647_p3 = scmp.ne.s32.totalorder %s38_s10, %s646_s20  ;;  %p652_p5 = scmp.lt.s32.totalorder %s646_s20, %s646_s20 }
   0xf   :  { %p653_p6 = por %p652_p5, %p651_p4 }
  0x11   :  { %p654_p7 = pnand %p653_p6, %p647_p3 }
  0x13   :  { %657 = shalt.err (!%p654_p7)
}
  0x14   :  { %s802_s21 = smov 64   ;;  %s803_s22 = smov 4  }
  0x15   :  { %43 = dma.hbm_to_vmem [thread:$0]  %s1017_s1, 128, %s38_s10, [#allocation6], %s802_s21, %s802_s21, %s803_s22  }
  0x16   :  { %s658_s27 = scalar_lea.hbm %s1020_s4, 1024 }
  0x17   :  { %p659_p8 = scmp.ne.s32.totalorder %s1020_s4, %s658_s27  ;;  %p662_p9 = scmp.lt.u32.totalorder %s658_s27, %s1020_s4 }
  0x19   :  { %p664_p10 = pnand %p662_p9, %p659_p8 }
  0x1b   :  { %667 = shalt.err (!%p664_p10)
}
  0x1c   :  { %s668_s13 = scalar_lea.vmem %s863_s12, 1024  ;;  %p673_p12 = scmp.lt.s32.totalorder %s863_s12, %s863_s12 }
  0x1d   :  { %p669_p11 = scmp.ne.s32.totalorder %s863_s12, %s668_s13  ;;  %p674_p13 = scmp.lt.s32.totalorder %s668_s13, %s668_s13 }
  0x1f   :  { %p675_p0 = por %p674_p13, %p673_p12 }
  0x21   :  { %p676_p1 = pnand %p675_p0, %p669_p11 }
  0x23   :  { %679 = shalt.err (!%p676_p1)
}
  0x24   :  { %69 = dma.hbm_to_vmem [thread:$0]  %s1020_s4, 1024, %s863_s12, [#allocation9], %s802_s21, %s802_s21, %s803_s22  }
  0x25   :  { %s804_s14 = smov [#allocation2]   ;;  %s805_s16 = smov [#allocation7]  }
  0x26   :  { %s25_s15 = sshll.u32 %s804_s14, 4  ;;  %s49_s17 = sshll.u32 %s805_s16, 4  ;;  %s26_s15 = int_to_ptr.vmem [resolvable:$true] %s25_s15  ;;  %s900_s17 = int_to_ptr.vmem [resolvable:$true] %s49_s17 }
  0x27   :  { %s680_s20 = scalar_lea.hbm %s1016_s0, 128 }
  0x28   :  { %p681_p2 = scmp.ne.s32.totalorder %s1016_s0, %s680_s20  ;;  %p684_p3 = scmp.lt.u32.totalorder %s680_s20, %s1016_s0 }
  0x2a   :  { %p686_p4 = pnand %p684_p3, %p681_p2 }
  0x2c   :  { %689 = shalt.err (!%p686_p4)
}
  0x2d   :  { %s690_s4 = scalar_lea.vmem %s26_s15, 128  ;;  %p695_p6 = scmp.lt.s32.totalorder %s26_s15, %s26_s15 }
  0x2e   :  { %p691_p5 = scmp.ne.s32.totalorder %s26_s15, %s690_s4  ;;  %p696_p7 = scmp.lt.s32.totalorder %s690_s4, %s690_s4 }
  0x30   :  { %p697_p8 = por %p696_p7, %p695_p6 }
  0x32   :  { %p698_p9 = pnand %p697_p8, %p691_p5 }
  0x34   :  { %701 = shalt.err (!%p698_p9)
}
  0x35   :  { %31 = dma.hbm_to_vmem [thread:$0]  %s1016_s0, 128, %s26_s15, [#allocation3], %s802_s21, %s802_s21, %s803_s22  }
  0x36   :  { %s702_s30 = scalar_lea.hbm %s1018_s2, 128 }
  0x37   :  { %p703_p10 = scmp.ne.s32.totalorder %s1018_s2, %s702_s30  ;;  %p706_p11 = scmp.lt.u32.totalorder %s702_s30, %s1018_s2 }
  0x39   :  { %p708_p12 = pnand %p706_p11, %p703_p10 }
  0x3b   :  { %711 = shalt.err (!%p708_p12)
}
  0x3c   :  { %s712_s14 = scalar_lea.vmem %s900_s17, 128  ;;  %p717_p0 = scmp.lt.s32.totalorder %s900_s17, %s900_s17 }
  0x3d   :  { %p713_p13 = scmp.ne.s32.totalorder %s900_s17, %s712_s14  ;;  %p718_p1 = scmp.lt.s32.totalorder %s712_s14, %s712_s14 }
  0x3f   :  { %p719_p2 = por %p718_p1, %p717_p0 }
  0x41   :  { %p720_p3 = pnand %p719_p2, %p713_p13 }
  0x43   :  { %723 = shalt.err (!%p720_p3)
}
  0x44   :  { %55 = dma.hbm_to_vmem [thread:$0]  %s1018_s2, 128, %s900_s17, [#allocation6], %s802_s21, %s802_s21, %s803_s22  }
  0x45   :  { %s806_s16 = smov [#allocation10]   ;;  %s724_s23 = scalar_lea.hbm %s1022_s6, 1024 }
  0x46   :  { %s77_s18 = sshll.u32 %s806_s16, 4  ;;  %p725_p4 = scmp.ne.s32.totalorder %s1022_s6, %s724_s23  ;;  %s78_s18 = int_to_ptr.vmem [resolvable:$true] %s77_s18 }
  0x47   :  { %p728_p5 = scmp.lt.u32.totalorder %s724_s23, %s1022_s6 }
  0x49   :  { %p730_p6 = pnand %p728_p5, %p725_p4 }
  0x4b   :  { %733 = shalt.err (!%p730_p6)
}
  0x4c   :  { %s734_s12 = scalar_lea.vmem %s78_s18, 1024  ;;  %p739_p8 = scmp.lt.s32.totalorder %s78_s18, %s78_s18 }
  0x4d   :  { %p735_p7 = scmp.ne.s32.totalorder %s78_s18, %s734_s12  ;;  %p740_p9 = scmp.lt.s32.totalorder %s734_s12, %s734_s12 }
  0x4f   :  { %p741_p10 = por %p740_p9, %p739_p8 }
  0x51   :  { %p742_p11 = pnand %p741_p10, %p735_p7 }
  0x53   :  { %745 = shalt.err (!%p742_p11)
}
  0x54   :  { %83 = dma.hbm_to_vmem [thread:$0]  %s1022_s6, 1024, %s78_s18, [#allocation9], %s802_s21, %s802_s21, %s803_s22  }
  0x55   :  { %790 = dma.done.wait [#allocation3], 128  }
  0x56   :  { %791 = vsyncadd [#allocation3], 4294967168 }
  0x57   :  { %792 = dma.done.wait [#allocation6], 256  }
  0x58   :  { %793 = vsyncadd [#allocation6], 4294967040 }
  0x59   :  { %794 = dma.done.wait [#allocation9], 2048  }
  0x5a   :  { %795 = vsyncadd [#allocation9], 4294965248  ;;  %v807_v0 = vmov 0.0   ;;  %vm808_vm0 = vmmov 0   ;;  %v617_v1 = vld [vmem:[%s1019_s3] sm:$0xff]   ;;  %v618_v2 = vld [vmem:[#allocation5] sm:$0xff]  }
  0x5b   :  { %552 = vmatprep.subr.bf16.mxu0 %v807_v0  ;;  %554 = vmatprep.mubr.msk.bf16.mxu0 %vm808_vm0, %v807_v0  ;;  %vm117_vm1 = vcmask 130048   ;;  %v619_v3 = vld [vmem:[#allocation8] sm:$0xff]   ;;  %v620_v4 = vld [vmem:[#allocation8 + $0x8] sm:$0xff]   ;;  %v621_v5 = vld [vmem:[#allocation8 + $0x10] sm:$0xff]  }
  0x5c   :  { %558 = vmatprep.subr.bf16.mxu1 %v807_v0  ;;  %574 = vmatprep.mubr.msk.bf16.mxu1 %vm808_vm0, %v807_v0  ;;  %v622_v6 = vld [vmem:[#allocation8 + $0x18] sm:$0xff]   ;;  %v623_v7 = vld [vmem:[#allocation8 + $0x20] sm:$0xff]   ;;  %v624_v8 = vld [vmem:[#allocation8 + $0x28] sm:$0xff]  }
  0x5d   :  { %553 = vmatpush3.bf16.msra.mxu0 %v617_v1  ;;  %559 = vmatpush3.bf16.msra.mxu1 %v619_v3  ;;  %v625_v9 = vld [vmem:[#allocation8 + $0x30] sm:$0xff]   ;;  %v626_v10 = vld [vmem:[#allocation8 + $0x38] sm:$0xff]   ;;  %v627_v11 = vld [vmem:[#allocation10] sm:$0xff]  }
  0x5e   :  { %578 = vmatprep.subr.bf16.mxu0 %v807_v0  ;;  %560 = vmatprep.subr.bf16.mxu1 %v807_v0  ;;  %v628_v12 = vld [vmem:[#allocation10 + $0x8] sm:$0xff]   ;;  %v629_v13 = vld [vmem:[#allocation10 + $0x10] sm:$0xff]   ;;  %v630_v14 = vld [vmem:[#allocation10 + $0x18] sm:$0xff]  }
  0x5f   :  { %v631_v15 = vld [vmem:[#allocation10 + $0x20] sm:$0xff]   ;;  %v632_v16 = vld [vmem:[#allocation10 + $0x28] sm:$0xff]   ;;  %v633_v27 = vld [vmem:[#allocation10 + $0x30] sm:$0xff]  }
  0x60   :  { %555 = vmatmul.mubr.msk.bf16.vlgmr.msra.gmra.mrb[0].mxu0 %vm117_vm1, %v618_v2  ;;  %v522_v17 = vld [vmem:[#allocation2] sm:$0xff]   ;;  %v634_v28 = vld [vmem:[#allocation10 + $0x38] sm:$0xff]  }
  0x61   :  { %594 = vmatprep.mubr.msk.bf16.mxu0 %vm808_vm0, %v807_v0  ;;  %561 = vmatpush3.bf16.msra.mxu1 %v620_v4  ;;  %v523_v18 = vunpack.c.l.bf16 %v522_v17  ;;  %v524_v19 = vunpack.c.h.bf16 %v522_v17  ;;  %v497_v29 = vld [vmem:[%s1021_s5] ss:$0 sm:$0xff]  ;;  %v635_v47 = vld [vmem:[#allocation7] sm:$0xff]   ;;  %s809_s5 = smov [#allocation11]  }
  0x62   :  { %562 = vmatprep.subr.bf16.mxu1 %v807_v0  ;;  %579 = vmatpush3.bf16.msra.mxu0 %v627_v11  ;;  %v506_v39 = vld [vmem:[%s1023_s7] ss:$0 sm:$0xff]  ;;  %s464_s11 = sshll.u32 %s809_s5, 4  ;;  %s465_s11 = int_to_ptr.vmem [resolvable:$true] %s464_s11 }
  0x63   :  { %580 = vmatprep.subr.bf16.mxu0 %v807_v0  ;;  %s746_s13 = scalar_lea.vmem %s465_s11, 128  ;;  %p751_p13 = scmp.lt.s32.totalorder %s465_s11, %s465_s11 }
  0x64   :  { %p747_p12 = scmp.ne.s32.totalorder %s465_s11, %s746_s13  ;;  %p752_p0 = scmp.lt.s32.totalorder %s746_s13, %s746_s13 }
  0x65   :  { %563 = vmatpush3.bf16.msra.mxu1 %v621_v5 }
  0x66   :  { %564 = vmatprep.subr.bf16.mxu1 %v807_v0  ;;  %581 = vmatpush3.bf16.msra.mxu0 %v628_v12  ;;  %p753_p1 = por %p752_p0, %p751_p13 }
  0x67   :  { %582 = vmatprep.subr.bf16.mxu0 %v807_v0 }
  0x68   :  { %p754_p2 = pnand %p753_p1, %p747_p12 }
  0x69   :  { %565 = vmatpush3.bf16.msra.mxu1 %v622_v6 }
  0x6a   :  { %566 = vmatprep.subr.bf16.mxu1 %v807_v0  ;;  %583 = vmatpush3.bf16.msra.mxu0 %v629_v13 }
  0x6b   :  { %584 = vmatprep.subr.bf16.mxu0 %v807_v0 }
  0x6d   :  { %567 = vmatpush3.bf16.msra.mxu1 %v623_v7 }
  0x6e   :  { %568 = vmatprep.subr.bf16.mxu1 %v807_v0  ;;  %585 = vmatpush3.bf16.msra.mxu0 %v630_v14 }
  0x6f   :  { %586 = vmatprep.subr.bf16.mxu0 %v807_v0 }
  0x71   :  { %569 = vmatpush3.bf16.msra.mxu1 %v624_v8 }
  0x72   :  { %570 = vmatprep.subr.bf16.mxu1 %v807_v0  ;;  %587 = vmatpush3.bf16.msra.mxu0 %v631_v15 }
  0x73   :  { %588 = vmatprep.subr.bf16.mxu0 %v807_v0 }
  0x75   :  { %571 = vmatpush3.bf16.msra.mxu1 %v625_v9 }
  0x76   :  { %572 = vmatprep.subr.bf16.mxu1 %v807_v0  ;;  %589 = vmatpush3.bf16.msra.mxu0 %v632_v16 }
  0x77   :  { %590 = vmatprep.subr.bf16.mxu0 %v807_v0 }
  0x79   :  { %573 = vmatpush3.bf16.msra.mxu1 %v626_v10 }
  0x7a   :  { %598 = vmatprep.subr.bf16.mxu1 %v807_v0  ;;  %591 = vmatpush3.bf16.msra.mxu0 %v633_v27 }
  0x7b   :  { %592 = vmatprep.subr.bf16.mxu0 %v807_v0 }
  0x7e   :  { %593 = vmatpush3.bf16.msra.mxu0 %v634_v28 }
 0x133   :  { %v155_v20 = vpop.f32.mrb[0].mxu0 }
 0x134   :  { %v556_v21 = vpop.f32.mrb[1].mxu0  ;;  %v166_v23 = vadd.f32 %v523_v18, %v155_v20 }
 0x135   :  { %v158_v22 = vpop.f32.mrb[2].mxu0 }
 0x136   :  { %v167_v24 = vadd.f32 %v524_v19, %v158_v22  ;;  %v557_v25 = vpop.f32.mrb[3].mxu0 }
 0x138   :  { %v168_v26 = vpack.c.bf16 %v167_v24, %v166_v23 }
 0x13a   :  { %575 = vmatmul.mubr.bf16.vlgmr.msra.gmra.mrb[0].mxu1 %v168_v26 }
 0x13b   :  { %600 = vmatprep.mubr.msk.bf16.mxu1 %vm808_vm0, %v807_v0 }
 0x20d   :  { %v274_v30 = vpop.f32.mrb[0].mxu1 }
 0x20e   :  { %v275_v31 = vadd.f32 %v497_v29, %v274_v30  ;;  %v576_v32 = vpop.f32.mrb[1].mxu1 }
 0x20f   :  { %v277_v33 = vpop.f32.mrb[2].mxu1 }
 0x210   :  { %v278_v34 = vadd.f32 %v497_v29, %v277_v33  ;;  %v577_v35 = vpop.f32.mrb[3].mxu1  ;;  %v281_v36 = vmax.f32 %v275_v31, 0.0 }
 0x212   :  { %v282_v37 = vmax.f32 %v278_v34, 0.0 }
 0x214   :  { %v283_v38 = vpack.c.bf16 %v282_v37, %v281_v36 }
 0x216   :  { %595 = vmatmul.mubr.bf16.vlgmr.msra.gmra.mrb[4].mxu0 %v283_v38 }
 0x2e9   :  { %v389_v40 = vpop.f32.mrb[4].mxu0 }
 0x2ea   :  { %v596_v41 = vpop.f32.mrb[5].mxu0  ;;  %v390_v43 = vadd.f32 %v506_v39, %v389_v40 }
 0x2eb   :  { %v392_v42 = vpop.f32.mrb[6].mxu0 }
 0x2ec   :  { %v393_v44 = vadd.f32 %v506_v39, %v392_v42  ;;  %v597_v45 = vpop.f32.mrb[7].mxu0 }
 0x2ee   :  { %v396_v46 = vpack.c.bf16 %v393_v44, %v390_v43 }
 0x2f0   :  { %529 = vst [vmem:[#allocation11] sm:$0xff] %v396_v46   ;;  %599 = vmatpush3.bf16.msra.mxu1 %v396_v46 }
 0x2f3   :  { %601 = vmatmul.mubr.msk.bf16.vlgmr.msra.gmra.mrb[4].mxu1 %vm117_vm1, %v635_v47 }
 0x2f4   :  { %757 = shalt.err (!%p754_p2)
}
 0x2f5   :  { %s758_s10 = scalar_lea.hbm %s1024_s8, 128 }
 0x2f6   :  { %p759_p3 = scmp.ne.s32.totalorder %s1024_s8, %s758_s10  ;;  %p762_p4 = scmp.lt.u32.totalorder %s758_s10, %s1024_s8 }
 0x2f8   :  { %p764_p5 = pnand %p762_p4, %p759_p3 }
 0x2fa   :  { %767 = shalt.err (!%p764_p5)
}
 0x2fb   :  { %470 = dma.vmem_to_hbm [thread:$0]  %s465_s11, 128, %s1024_s8, [#allocation4], %s802_s21, %s802_s21, %s803_s22  }
 0x2fc   :  { %s810_s20 = smov [#allocation12]  }
 0x2fd   :  { %s476_s23 = sshll.u32 %s810_s20, 4  ;;  %s477_s23 = int_to_ptr.vmem [resolvable:$true] %s476_s23 }
 0x2fe   :  { %s768_s24 = scalar_lea.vmem %s477_s23, 256  ;;  %p773_p7 = scmp.lt.s32.totalorder %s477_s23, %s477_s23 }
 0x2ff   :  { %p769_p6 = scmp.ne.s32.totalorder %s477_s23, %s768_s24  ;;  %p774_p8 = scmp.lt.s32.totalorder %s768_s24, %s768_s24 }
 0x301   :  { %p775_p9 = por %p774_p8, %p773_p7 }
 0x303   :  { %p776_p10 = pnand %p775_p9, %p769_p6 }
 0x3c6   :  { %v450_v48 = vpop.f32.mrb[4].mxu1 }
 0x3c7   :  { %457 = vst [vmem:[#allocation12] sm:$0xff] %v450_v48  ;;  %v602_v49 = vpop.f32.mrb[5].mxu1 }
 0x3c8   :  { %v453_v50 = vpop.f32.mrb[6].mxu1 }
 0x3c9   :  { %458 = vst [vmem:[#allocation12 + $0x8] sm:$0xff] %v453_v50  ;;  %v603_v51 = vpop.f32.mrb[7].mxu1 }
 0x3ca   :  { %779 = shalt.err (!%p776_p10)
}
 0x3cb   :  { %s780_s8 = scalar_lea.hbm %s1025_s9, 256 }
 0x3cc   :  { %p781_p11 = scmp.ne.s32.totalorder %s1025_s9, %s780_s8  ;;  %p784_p12 = scmp.lt.u32.totalorder %s780_s8, %s1025_s9 }
 0x3ce   :  { %p786_p13 = pnand %p784_p12, %p781_p11 }
 0x3d0   :  { %789 = shalt.err (!%p786_p13)
}
 0x3d1   :  { %s811_s2 = smov 128   ;;  %s812_s17 = smov 8  }
 0x3d2   :  { %482 = dma.vmem_to_hbm [thread:$0]  %s477_s23, 256, %s1025_s9, [#allocation13], %s811_s2, %s811_s2, %s812_s17  }
 0x3d3   :  { %796 = dma.done.wait [#allocation4], 128  }
 0x3d4   :  { %797 = vsyncadd [#allocation4], 4294967168 }
 0x3d5   :  { %798 = dma.done.wait [#allocation13], 256  }
 0x3d6   :  { %799 = vsyncadd [#allocation13], 4294967040 }
 0x3d7   :  { %489 = vsyncpa [#allocation3], 1 }
 0x3d8   :  { %490 = vsyncpa [#allocation6], 1 }
 0x3d9   :  { %491 = vsyncpa [#allocation9], 1 }
 0x3da   :  { %492 = vsyncpa [#allocation4], 1 }
 0x3db   :  { %493 = vsyncpa [#allocation13], 1 }

</bundles_post_ra>
